<compile_context>
chip_gen: v7x
topology: tpu7x:2x2x1
jax: 0.10.0
libtpu: 0.0.40
codegen_flags: <defaults>
</compile_context>

<pallas_src>
import jax
import jax.numpy as jnp
from jax.experimental import pallas as pl
from jax.experimental.pallas import tpu as pltpu


def _round_up(n: int, m: int) -> int:
    return ((n + m - 1) // m) * m


def _net_kernel(x_ref, w_ref, b_ref, o_ref):
    # x_ref: (tm, S) batch tile; w_ref: (S, A) folded weights; b_ref: (1, A) bias.
    acc = jnp.dot(x_ref[...], w_ref[...], preferred_element_type=jnp.float32)
    o_ref[...] = (acc + b_ref[...]).astype(o_ref.dtype)


def fold_params(w1, b1, w2, b2):
    """Fold fc2(fc1(x)) into one affine map (valid: no activation in between).
    Call once per parameter update, not per forward call."""
    wf = jnp.dot(w1, w2).astype(jnp.float32)          # (n_states, n_action)
    bf = (jnp.dot(b1, w2) + b2).astype(jnp.float32)   # (1, n_action)
    return wf, bf


@jax.jit
def net_forward(x, wf, bf):
    """x: (B, n_states) -> (B, n_action) == fc2(fc1(x)) of the PyTorch module."""
    B, S = x.shape
    A = wf.shape[1]

    # Single grid step for typical DQN batches; 1024-row tiles only when huge.
    if B <= 4096:
        B_pad = _round_up(max(B, 1), 8)
        tm = B_pad
    else:
        tm = 1024
        B_pad = _round_up(B, tm)

    x = x.astype(jnp.float32)
    if B_pad != B:
        x = jnp.pad(x, ((0, B_pad - B), (0, 0)))   # one HLO, batch dim only

    cost = pl.CostEstimate(
        flops=2 * B_pad * S * A,
        transcendentals=0,
        bytes_accessed=4 * (B_pad * S + S * A + A + B_pad * A),
    )

    out = pl.pallas_call(
        _net_kernel,
        out_shape=jax.ShapeDtypeStruct((B_pad, A), jnp.float32),
        grid=(B_pad // tm,),
        in_specs=[
            pl.BlockSpec((tm, S), lambda i: (i, 0)),  # batch tile of x
            pl.BlockSpec((S, A), lambda i: (0, 0)),   # folded weights (resident)
            pl.BlockSpec((1, A), lambda i: (0, 0)),   # folded bias (resident)
        ],
        out_specs=pl.BlockSpec((tm, A), lambda i: (i, 0)),
        compiler_params=pltpu.CompilerParams(
            dimension_semantics=("parallel",),  # shards batch tiles across TCs (v7x)
        ),
        cost_estimate=cost,
    )(x, wf, bf)

    return out[:B] if B_pad != B else out


def init_params(key, n_states, n_hidden, n_action):
    """Mimics PyTorch nn.Linear default init U(-1/sqrt(fan_in), +1/sqrt(fan_in)).
    Weights stored as (in, out) = transpose of PyTorch's (out, in) layout."""
    k1, k2, k3, k4 = jax.random.split(key, 4)
    bound1 = 1.0 / jnp.sqrt(jnp.float32(n_states))
    bound2 = 1.0 / jnp.sqrt(jnp.float32(n_hidden))
    w1 = jax.random.uniform(k1, (n_states, n_hidden), jnp.float32, -bound1, bound1)
    b1 = jax.random.uniform(k2, (1, n_hidden), jnp.float32, -bound1, bound1)
    w2 = jax.random.uniform(k3, (n_hidden, n_action), jnp.float32, -bound2, bound2)
    b2 = jax.random.uniform(k4, (1, n_action), jnp.float32, -bound2, bound2)
    return w1, b1, w2, b2


if __name__ == "__main__":
    n_states, n_hidden, n_action = 4, 32, 8
    batch = 2

    key = jax.random.PRNGKey(0)
    kx, kp = jax.random.split(key)
    x = jax.random.normal(kx, (batch, n_states), jnp.float32)
    w1, b1, w2, b2 = init_params(kp, n_states, n_hidden, n_action)

    # One-time parameter folding (at "parameter update" time, not per forward).
    wf, bf = fold_params(w1, b1, w2, b2)

    # Small batch (single-tile path, B padded 2 -> 8).
    out = jax.block_until_ready(net_forward(x, wf, bf))
    ref = (x @ w1 + b1) @ w2 + b2
    assert out.shape == (batch, n_action)
    assert jnp.allclose(out, ref, atol=1e-5, rtol=1e-5)

    # Medium batch (still a single grid step, B padded 300 -> 304).
    xb = jax.random.normal(jax.random.PRNGKey(1), (300, n_states), jnp.float32)
    outb = jax.block_until_ready(net_forward(xb, wf, bf))
    refb = (xb @ w1 + b1) @ w2 + b2
    assert outb.shape == (300, n_action)
    assert jnp.allclose(outb, refb, atol=1e-5, rtol=1e-5)

    # Large batch exercising the tiled (grid > 1, tm=1024) path.
    xl = jax.random.normal(jax.random.PRNGKey(2), (5000, n_states), jnp.float32)
    outl = jax.block_until_ready(net_forward(xl, wf, bf))
    refl = (xl @ w1 + b1) @ w2 + b2
    assert outl.shape == (5000, n_action)
    assert jnp.allclose(outl, refl, atol=1e-5, rtol=1e-5)

    print("KERNEL_OK")
</pallas_src>

<mosaic_0001>
module attributes {stable_mosaic.version = 11 : i64} {
  func.func @_net_kernel(%arg0: i32, %arg1: memref<8x4xf32, #tpu.memory_space<vmem>>, %arg2: memref<4x8xf32, #tpu.memory_space<vmem>>, %arg3: memref<1x8xf32, #tpu.memory_space<vmem>>, %arg4: memref<8x8xf32, #tpu.memory_space<vmem>>) attributes {dimension_semantics = [#tpu.dimension_semantics<parallel>], iteration_bounds = array<i64: 1>, scalar_prefetch = 0 : i64, scratch_operands = 0 : i64, tpu.core_type = #tpu.core_type<tc>, window_params = [{transform_indices = @transform_0, window_bounds = array<i64: 8, 4>}, {pipeline_mode = #tpu.pipeline_mode<synchronous>, transform_indices = @transform_1, window_bounds = array<i64: 4, 8>}, {pipeline_mode = #tpu.pipeline_mode<synchronous>, transform_indices = @transform_2, window_bounds = array<i64: 1, 8>}, {transform_indices = @transform_3, window_bounds = array<i64: 8, 8>}]} {
    %c0 = arith.constant 0 : index
    %c0_0 = arith.constant 0 : index
    %0 = vector.load %arg1[%c0, %c0_0] : memref<8x4xf32, #tpu.memory_space<vmem>>, vector<8x4xf32>
    %c0_1 = arith.constant 0 : index
    %c0_2 = arith.constant 0 : index
    %1 = vector.load %arg2[%c0_1, %c0_2] : memref<4x8xf32, #tpu.memory_space<vmem>>, vector<4x8xf32>
    %cst = arith.constant dense<0.000000e+00> : vector<8x8xf32>
    %2 = tpu.matmul %0, %1, %cst {dimension_numbers = #tpu.dot_dimension_numbers<[1], [0], [0], [1], [0, 0, 1, 1], [], []>} : vector<8x4xf32>, vector<4x8xf32>, vector<8x8xf32> -> vector<8x8xf32>
    %c0_3 = arith.constant 0 : index
    %c0_4 = arith.constant 0 : index
    %3 = vector.load %arg3[%c0_3, %c0_4] : memref<1x8xf32, #tpu.memory_space<vmem>>, vector<1x8xf32>
    %4 = vector.broadcast %3 : vector<1x8xf32> to vector<8x8xf32>
    %5 = arith.addf %2, %4 : vector<8x8xf32>
    %c0_5 = arith.constant 0 : index
    %c0_6 = arith.constant 0 : index
    %6 = vector.load %arg4[%c0_5, %c0_6] : memref<8x8xf32, #tpu.memory_space<vmem>>, vector<8x8xf32>
    tpu.vector_store %arg4[%c0_5, %c0_6], %5 {strides = array<i32>} : memref<8x8xf32, #tpu.memory_space<vmem>>, vector<8x8xf32>,
    return
  }
  func.func @transform_0(%arg0: i32) -> (i32, i32) {
    %c0_i32 = arith.constant 0 : i32
    %c0_i32_0 = arith.constant 0 : i32
    return %arg0, %c0_i32 : i32, i32
  }
  func.func @transform_1(%arg0: i32) -> (i32, i32) {
    %c0_i32 = arith.constant 0 : i32
    %c0_i32_0 = arith.constant 0 : i32
    %c0_i32_1 = arith.constant 0 : i32
    return %c0_i32, %c0_i32_0 : i32, i32
  }
  func.func @transform_2(%arg0: i32) -> (i32, i32) {
    %c0_i32 = arith.constant 0 : i32
    %c0_i32_0 = arith.constant 0 : i32
    %c0_i32_1 = arith.constant 0 : i32
    return %c0_i32, %c0_i32_0 : i32, i32
  }
  func.func @transform_3(%arg0: i32) -> (i32, i32) {
    %c0_i32 = arith.constant 0 : i32
    %c0_i32_0 = arith.constant 0 : i32
    return %arg0, %c0_i32 : i32, i32
  }
}

</mosaic_0001>

<bundles_post_ra>
// kernel: net_forward.1
= control target key start
LH: loop header
LB: loop body
LE: loop exit
PB: predicated region body
PF: predicated region fallthrough
CT: control target
= control target key end

     0   :  { %vm27_vm0 = vcmask 1043456   ;;  %vm23_vm1 = vcmask 31744   ;;  %v119_v0 = vmov 0.0   ;;  %vm120_vm2 = vmmov 0   ;;  %s153_s1 = inlined_call_operand.vmem [shape: f32[4,8], index: 1, kind: input, shape index: {}]   ;;  %s154_s0 = inlined_call_operand.vmem [shape: f32[8,4], index: 0, kind: input, shape index: {}]   ;;  %s155_s2 = inlined_call_operand.vmem [shape: f32[1,8], index: 2, kind: input, shape index: {}]   ;;  %s156_s3 = inlined_call_operand.vmem [shape: f32[8,8], index: 3, kind: output, shape index: {}]  }
   0x1   :  { %112 = vmatprep.subr.mxu0 %v119_v0  ;;  %v15_v1 = vld [vmem:[%s153_s1] sm:$0xf]  ;;  %114 = vmatprep.mubr.msk.f32.mxu0 %vm120_vm2, %v119_v0  ;;  %vm101_vm3 = vcmask 64512  }
   0x2   :  { %v14_v2 = vld [vmem:[%s154_s0] sm:$0xff]  ;;  %113 = vmatpush3.msk.msra.mxu0 %vm27_vm0, %v15_v1 }
   0x3   :  { %115 = vmatmul.mubr.msk.f32.vlgmr.msra.gmra.mrb[0].mxu0 %vm23_vm1, %v14_v2  ;;  %v107_v3 = vld [vmem:[%s155_s2] ss:$0 sm:$0xff] }
  0xd6   :  { %v97_v4 = vpop.f32.mrb[0].mxu0 }
  0xd7   :  { %v98_v5 = vadd.f32 %v107_v3, %v97_v4  ;;  %v116_v6 = vpop.f32.mrb[1].mxu0 }
  0xd9   :  { %102 = vst.msk [vmem:[%s156_s3] sm:$0xff] %vm101_vm3, %v98_v5 }

</bundles_post_ra>
